<compile_context>
chip_gen: v6e
topology: v6e:2x2x1
jax: 0.10.0
libtpu: 0.0.40
codegen_flags: <defaults>
</compile_context>

<pallas_src>
import functools

import jax
import jax.numpy as jnp
from jax import lax
from jax.experimental import pallas as pl
from jax.experimental.pallas import tpu as pltpu

LANE = 128


def _round_up(x, m):
    return ((x + m - 1) // m) * m


def _vmem_capacity_bytes():
    """Per-TensorCore VMEM capacity (generation-aware, conservative fallback)."""
    try:
        info = pltpu.get_tpu_info()
        cap = getattr(info, "vmem_capacity_bytes", None)
        if cap:
            return int(cap)
    except Exception:
        pass
    return 64 << 20  # v7x per-TC VMEM; safe lower bound for v5e/v6e as well


def _agg_footprint(tm, tk, n_cols_p, d_out_p, itemsize, xw_resident):
    """VMEM bytes needed by the aggregation pass (no double counting)."""
    adj_b = 2 * tm * tk * itemsize                                  # 2x-buffered adj tiles
    xw_b = 2 * (n_cols_p if xw_resident else tk) * d_out_p * itemsize
    out_b = 2 * tm * d_out_p * 4                                    # f32 output row tiles
    bias_b = 2 * d_out_p * 4
    return adj_b + xw_b + out_b + bias_b


def _pick_agg_tiles(N, d_out_p, itemsize, budget):
    """Pick (tm, tk) for the N x N aggregation pass.

    Prefers big lane-contiguous tiles subject to the per-generation VMEM
    budget, bounded padding waste, and >= 2 row tiles so the 'parallel' row
    axis can feed both v7x TensorCores (harmless on single-TC v5e/v6e).
    """
    n128 = _round_up(N, LANE)
    max_padded = (n128 * n128 * 5) // 4          # <= 25% padding overhead
    cands = (1024, 512, 256, 128)
    best, best_area = (128, 128), 0
    for tm in cands:
        if tm > n128:
            continue
        if n128 >= 2 * LANE and _round_up(N, tm) // tm < 2:
            continue                              # keep both v7x TCs busy
        for tk in cands:
            if tk > n128:
                continue
            n_rows_p = _round_up(N, tm)
            n_cols_p = _round_up(N, tk)
            if n_rows_p * n_cols_p > max_padded:
                continue
            resident = 2 * n_cols_p * d_out_p * itemsize <= budget // 3
            if _agg_footprint(tm, tk, n_cols_p, d_out_p, itemsize,
                              resident) > budget:
                continue
            area = tm * tk
            if area > best_area or (area == best_area and tk > best[1]):
                best, best_area = (tm, tk), area
    return best


def _clamp_vmem(need_bytes, capacity):
    """Scoped-VMEM request: what the kernel needs + headroom, never > physical."""
    hi = (capacity * 7) // 8
    return int(max(min(need_bytes + (8 << 20), hi), min(32 << 20, hi)))


def _pad2(x, rows, cols, dtype):
    x = x.astype(dtype)
    pr, pc = rows - x.shape[0], cols - x.shape[1]
    if pr or pc:
        # TODO(synk): for huge graphs, replace this wrapper-side zero pad of the
        # adjacency with in-kernel ragged-tail masking (broadcasted_iota compare)
        # to avoid the extra HBM round trip on unaligned N.
        x = jnp.pad(x, ((0, pr), (0, pc)))
    return x


# ----------------------------- kernels --------------------------------------


def _small_fused_kernel(adj_ref, x_ref, w_ref, b_ref, o_ref):
    # Whole problem resident in VMEM: out = A @ (X @ W^T) + b in one launch.
    xw = jnp.dot(x_ref[...], w_ref[...], preferred_element_type=jnp.float32)
    o_ref[...] = (
        jnp.dot(adj_ref[...], xw.astype(adj_ref.dtype),
                preferred_element_type=jnp.float32)
        + b_ref[...])


def _proj_kernel(x_ref, w_ref, o_ref):
    # x_ref: (tproj, d_in_p); w_ref: (d_in_p, d_out_p) resident; o_ref: (tproj, d_out_p)
    o_ref[...] = jnp.dot(
        x_ref[...], w_ref[...],
        preferred_element_type=jnp.float32).astype(o_ref.dtype)


def _agg_kernel(remap_ref, mask_ref, adj_ref, xw_ref, b_ref, o_ref,
                *, n_k, tk, xw_resident):
    # remap_ref/mask_ref: scalar-prefetched SMEM tables, flat (n_i * n_k,) int32.
    # adj_ref: (tm, tk) adjacency tile (DMA dedup'd for all-zero tiles).
    # xw_ref : (n_cols_p, d_out_p) resident  OR  (tk, d_out_p) streamed.
    # b_ref  : (1, d_out_p) f32 bias.
    # o_ref  : (tm, d_out_p) f32 output row tile, resident across k.
    i = pl.program_id(0)
    k = pl.program_id(1)

    @pl.when(k == 0)
    def _():
        # Fold bias into the accumulator init (no scratch, no finalize add).
        o_ref[...] = jnp.broadcast_to(b_ref[...], o_ref.shape)

    @pl.when(mask_ref[i * n_k + k] != 0)
    def _():
        if xw_resident:
            xw = xw_ref[pl.ds(pl.multiple_of(k * tk, tk), tk), :]
        else:
            xw = xw_ref[...]
        o_ref[...] += jnp.dot(adj_ref[...], xw,
                              preferred_element_type=jnp.float32)


# ----------------------------- wrapper ---------------------------------------


@functools.partial(
    jax.jit,
    static_argnames=("tm", "tk", "compute_dtype", "xw_resident",
                     "exploit_sparsity"))
def gcn_layer(norm_adj, features, weight, bias, *, tm=None, tk=None,
              compute_dtype=jnp.bfloat16, xw_resident=None,
              exploit_sparsity=True):
    """out = norm_adj @ features @ weight.T + bias  (nn.Linear semantics, f32 out)."""
    N = norm_adj.shape[0]
    d_in = features.shape[1]
    d_out = weight.shape[0]

    cd = jnp.dtype(compute_dtype)
    itemsize = cd.itemsize
    d_in_p = _round_up(d_in, LANE)
    d_out_p = _round_up(d_out, LANE)

    capacity = _vmem_capacity_bytes()
    budget = min((capacity * 3) // 4, 96 << 20)   # ~48 MiB on v7x, 96 MiB on v5e/v6e

    bias_p = jnp.pad(bias.astype(jnp.float32), (0, d_out_p - d_out))[None, :]
    w_t_p = _pad2(weight.T, d_in_p, d_out_p, cd)

    # ------- small graphs: one fused launch, everything VMEM-resident -------
    n_sq = _round_up(N, LANE)
    small_need = (2 * (n_sq * n_sq + n_sq * d_in_p + d_in_p * d_out_p) * itemsize
                  + 2 * (n_sq + 1) * d_out_p * 4)
    if tm is None and tk is None and n_sq <= 1024 and small_need <= budget:
        adj_p = _pad2(norm_adj, n_sq, n_sq, cd)
        feat_p = _pad2(features, n_sq, d_in_p, cd)
        out_p = pl.pallas_call(
            _small_fused_kernel,
            out_shape=jax.ShapeDtypeStruct((n_sq, d_out_p), jnp.float32),
            grid_spec=pltpu.PrefetchScalarGridSpec(
                num_scalar_prefetch=0,
                grid=(1,),
                in_specs=[
                    pl.BlockSpec((n_sq, n_sq), lambda i: (0, 0)),
                    pl.BlockSpec((n_sq, d_in_p), lambda i: (0, 0)),
                    pl.BlockSpec((d_in_p, d_out_p), lambda i: (0, 0)),
                    pl.BlockSpec((1, d_out_p), lambda i: (0, 0)),
                ],
                out_specs=pl.BlockSpec((n_sq, d_out_p), lambda i: (0, 0)),
            ),
            compiler_params=pltpu.CompilerParams(
                dimension_semantics=("arbitrary",),
                vmem_limit_bytes=_clamp_vmem(small_need, capacity),
            ),
        )(adj_p, feat_p, w_t_p, bias_p)
        return out_p[:N, :d_out]

    # ------- large graphs: projection pass + tiled aggregation pass -------
    if tm is None or tk is None:
        tm_a, tk_a = _pick_agg_tiles(N, d_out_p, itemsize, budget)
        tm = tm if tm is not None else tm_a
        tk = tk if tk is not None else tk_a

    n_rows_p = _round_up(N, tm)
    n_cols_p = _round_up(N, tk)
    n_i = n_rows_p // tm
    n_k = n_cols_p // tk

    if xw_resident is None:
        xw_resident = 2 * n_cols_p * d_out_p * itemsize <= budget // 3

    adj_p = _pad2(norm_adj, n_rows_p, n_cols_p, cd)
    feat_p = _pad2(features, n_cols_p, d_in_p, cd)

    # --- tile-level sparsity: nonzero mask + DMA-dedup remap table (SMEM) ---
    if exploit_sparsity:
        # TODO(synk): for a fixed graph reused across layers/steps, hoist this
        # (it reads the adjacency once) and pass the tables in precomputed.
        nz = jnp.any(adj_p.reshape(n_i, tm, n_k, tk) != 0, axis=(1, 3))
    else:
        nz = jnp.ones((n_i, n_k), dtype=bool)
    kk = lax.broadcasted_iota(jnp.int32, (n_i, n_k), 1)
    remap_tbl = jnp.maximum(
        lax.cummax(jnp.where(nz, kk, -1), axis=1), 0).astype(jnp.int32)
    remap_flat = remap_tbl.reshape(-1)
    mask_flat = nz.astype(jnp.int32).reshape(-1)

    # --- pass 1: XW = features @ W^T (cheap; d_out <= d_in) ---
    tproj = 128
    for c in (1024, 512, 256):
        if n_cols_p % c == 0:
            tproj = c
            break
    proj_need = (2 * (tproj * d_in_p + d_in_p * d_out_p) * itemsize
                 + 2 * tproj * d_out_p * itemsize)
    xw = pl.pallas_call(
        _proj_kernel,
        out_shape=jax.ShapeDtypeStruct((n_cols_p, d_out_p), cd),
        grid_spec=pltpu.PrefetchScalarGridSpec(
            num_scalar_prefetch=0,
            grid=(n_cols_p // tproj,),
            in_specs=[
                pl.BlockSpec((tproj, d_in_p), lambda i: (i, 0)),
                pl.BlockSpec((d_in_p, d_out_p), lambda i: (0, 0)),
            ],
            out_specs=pl.BlockSpec((tproj, d_out_p), lambda i: (i, 0)),
        ),
        compiler_params=pltpu.CompilerParams(
            dimension_semantics=("parallel",),
            vmem_limit_bytes=_clamp_vmem(proj_need, capacity),
        ),
    )(feat_p, w_t_p)

    # --- pass 2: out = norm_adj @ XW + bias (dominant, HBM-bound) ---
    if xw_resident:
        xw_spec = pl.BlockSpec((n_cols_p, d_out_p), lambda i, k, r, m: (0, 0))
    else:
        xw_spec = pl.BlockSpec((tk, d_out_p), lambda i, k, r, m: (k, 0))

    agg_need = _agg_footprint(tm, tk, n_cols_p, d_out_p, itemsize, xw_resident)
    kernel = functools.partial(_agg_kernel, n_k=n_k, tk=tk,
                               xw_resident=xw_resident)
    out_p = pl.pallas_call(
        kernel,
        out_shape=jax.ShapeDtypeStruct((n_rows_p, d_out_p), jnp.float32),
        grid_spec=pltpu.PrefetchScalarGridSpec(
            num_scalar_prefetch=2,
            grid=(n_i, n_k),
            in_specs=[
                pl.BlockSpec((tm, tk),
                             lambda i, k, r, m: (i, r[i * n_k + k])),
                xw_spec,
                pl.BlockSpec((1, d_out_p), lambda i, k, r, m: (0, 0)),
            ],
            out_specs=pl.BlockSpec((tm, d_out_p), lambda i, k, r, m: (i, 0)),
        ),
        compiler_params=pltpu.CompilerParams(
            dimension_semantics=("parallel", "arbitrary"),
            vmem_limit_bytes=_clamp_vmem(agg_need, capacity),
        ),
    )(remap_flat, mask_flat, adj_p, xw, bias_p)

    return out_p[:N, :d_out]


def reference(norm_adj, features, weight, bias):
    return norm_adj @ features @ weight.T + bias[None, :]


if __name__ == "__main__":
    key = jax.random.PRNGKey(0)
    k1, k2, k3, k4, k5, k6, k7, k8 = jax.random.split(key, 8)

    # Sanity on the pure-python auto tile picker (not hit by the forced-tile tests).
    tm_a, tk_a = _pick_agg_tiles(4096, 128, 2, 48 << 20)
    assert tm_a % LANE == 0 and tk_a % LANE == 0

    # ---- test A: small graph, defaults (bf16 streams, fused single-launch) ----
    N, d_in, d_out = 64, 32, 16
    raw = jax.random.uniform(k1, (N, N), dtype=jnp.float32)
    adj = jnp.minimum((raw > 0.8).astype(jnp.float32)
                      + jnp.eye(N, dtype=jnp.float32), 1.0)
    norm_adj = adj / jnp.sum(adj, axis=1, keepdims=True)
    features = jax.random.normal(k2, (N, d_in), dtype=jnp.float32)
    bound = 1.0 / (d_in ** 0.5)
    weight = jax.random.uniform(k3, (d_out, d_in), minval=-bound, maxval=bound)
    bias = jax.random.uniform(k4, (d_out,), minval=-bound, maxval=bound)

    ref = reference(norm_adj, features, weight, bias)
    out = jax.block_until_ready(gcn_layer(norm_adj, features, weight, bias))
    assert out.shape == (N, d_out)
    assert jnp.allclose(out, ref, atol=3e-2, rtol=3e-2), "small/bf16 mismatch"

    out32 = jax.block_until_ready(
        gcn_layer(norm_adj, features, weight, bias, compute_dtype=jnp.float32))
    assert jnp.allclose(out32, ref, atol=3e-5, rtol=3e-5), "small/f32 mismatch"

    # ---- tests B/C/D: unaligned medium graph (padding, tiling, sparsity skip) ----
    Nm, d_in_m, d_out_m = 200, 40, 24
    rawm = jax.random.uniform(k5, (Nm, Nm), dtype=jnp.float32)
    adjm = jnp.minimum((rawm > 0.85).astype(jnp.float32)
                       + jnp.eye(Nm, dtype=jnp.float32), 1.0)
    adjm = adjm.at[:128, 128:].set(0.0)      # make adjacency tile (0,1) all-zero
    norm_adjm = adjm / jnp.sum(adjm, axis=1, keepdims=True)
    featm = jax.random.normal(k6, (Nm, d_in_m), dtype=jnp.float32)
    bm = 1.0 / (d_in_m ** 0.5)
    wm = jax.random.uniform(k7, (d_out_m, d_in_m), minval=-bm, maxval=bm)
    bsm = jax.random.uniform(k8, (d_out_m,), minval=-bm, maxval=bm)
    refm = reference(norm_adjm, featm, wm, bsm)

    # B: tiled path, f32 streams, resident XW, sparsity skip
    outB = jax.block_until_ready(
        gcn_layer(norm_adjm, featm, wm, bsm, tm=128, tk=128,
                  compute_dtype=jnp.float32))
    assert outB.shape == (Nm, d_out_m)
    assert jnp.allclose(outB, refm, atol=3e-5, rtol=3e-5), "tiled/f32 mismatch"

    # C: tiled path, default bf16 streams (production default for large graphs)
    outC = jax.block_until_ready(
        gcn_layer(norm_adjm, featm, wm, bsm, tm=128, tk=128))
    assert jnp.allclose(outC, refm, atol=3e-2, rtol=3e-2), "tiled/bf16 mismatch"

    # D: tiled path, f32, streamed (non-resident) XW fallback branch
    outD = jax.block_until_ready(
        gcn_layer(norm_adjm, featm, wm, bsm, tm=128, tk=128,
                  compute_dtype=jnp.float32, xw_resident=False))
    assert jnp.allclose(outD, refm, atol=3e-5, rtol=3e-5), "tiled/streamed mismatch"

    print("KERNEL_OK")
</pallas_src>

<mosaic_0001>
module attributes {stable_mosaic.version = 11 : i64} {
  func.func @_small_fused_kernel(%arg0: i32, %arg1: memref<128x128xbf16, #tpu.memory_space<vmem>>, %arg2: memref<128x128xbf16, #tpu.memory_space<vmem>>, %arg3: memref<128x128xbf16, #tpu.memory_space<vmem>>, %arg4: memref<1x128xf32, #tpu.memory_space<vmem>>, %arg5: memref<128x128xf32, #tpu.memory_space<vmem>>) attributes {dimension_semantics = [#tpu.dimension_semantics<arbitrary>], iteration_bounds = array<i64: 1>, scalar_prefetch = 0 : i64, scratch_operands = 0 : i64, tpu.core_type = #tpu.core_type<tc>, window_params = [{pipeline_mode = #tpu.pipeline_mode<synchronous>, transform_indices = @transform_0, window_bounds = array<i64: 128, 128>}, {pipeline_mode = #tpu.pipeline_mode<synchronous>, transform_indices = @transform_1, window_bounds = array<i64: 128, 128>}, {pipeline_mode = #tpu.pipeline_mode<synchronous>, transform_indices = @transform_2, window_bounds = array<i64: 128, 128>}, {pipeline_mode = #tpu.pipeline_mode<synchronous>, transform_indices = @transform_3, window_bounds = array<i64: 1, 128>}, {pipeline_mode = #tpu.pipeline_mode<synchronous>, transform_indices = @transform_4, window_bounds = array<i64: 128, 128>}]} {
    %c0 = arith.constant 0 : index
    %c0_0 = arith.constant 0 : index
    %0 = vector.load %arg2[%c0, %c0_0] : memref<128x128xbf16, #tpu.memory_space<vmem>>, vector<128x128xbf16>
    %c0_1 = arith.constant 0 : index
    %c0_2 = arith.constant 0 : index
    %1 = vector.load %arg3[%c0_1, %c0_2] : memref<128x128xbf16, #tpu.memory_space<vmem>>, vector<128x128xbf16>
    %cst = arith.constant dense<0.000000e+00> : vector<128x128xf32>
    %2 = tpu.matmul %0, %1, %cst {dimension_numbers = #tpu.dot_dimension_numbers<[1], [0], [0], [1], [0, 0, 1, 1], [], []>} : vector<128x128xbf16>, vector<128x128xbf16>, vector<128x128xf32> -> vector<128x128xf32>
    %c0_3 = arith.constant 0 : index
    %c0_4 = arith.constant 0 : index
    %3 = vector.load %arg1[%c0_3, %c0_4] : memref<128x128xbf16, #tpu.memory_space<vmem>>, vector<128x128xbf16>
    %4 = arith.truncf %2 : vector<128x128xf32> to vector<128x128xbf16>
    %cst_5 = arith.constant dense<0.000000e+00> : vector<128x128xf32>
    %5 = tpu.matmul %3, %4, %cst_5 {dimension_numbers = #tpu.dot_dimension_numbers<[1], [0], [0], [1], [0, 0, 1, 1], [], []>} : vector<128x128xbf16>, vector<128x128xbf16>, vector<128x128xf32> -> vector<128x128xf32>
    %c0_6 = arith.constant 0 : index
    %c0_7 = arith.constant 0 : index
    %6 = vector.load %arg4[%c0_6, %c0_7] : memref<1x128xf32, #tpu.memory_space<vmem>>, vector<1x128xf32>
    %7 = vector.broadcast %6 : vector<1x128xf32> to vector<128x128xf32>
    %8 = arith.addf %5, %7 : vector<128x128xf32>
    %c0_8 = arith.constant 0 : index
    %c0_9 = arith.constant 0 : index
    %9 = vector.load %arg5[%c0_8, %c0_9] : memref<128x128xf32, #tpu.memory_space<vmem>>, vector<128x128xf32>
    tpu.vector_store %arg5[%c0_8, %c0_9], %8 {strides = array<i32>} : memref<128x128xf32, #tpu.memory_space<vmem>>, vector<128x128xf32>,
    return
  }
  func.func @transform_0(%arg0: i32) -> (i32, i32) {
    %c0_i32 = arith.constant 0 : i32
    %c0_i32_0 = arith.constant 0 : i32
    %c0_i32_1 = arith.constant 0 : i32
    return %c0_i32, %c0_i32_0 : i32, i32
  }
  func.func @transform_1(%arg0: i32) -> (i32, i32) {
    %c0_i32 = arith.constant 0 : i32
    %c0_i32_0 = arith.constant 0 : i32
    %c0_i32_1 = arith.constant 0 : i32
    return %c0_i32, %c0_i32_0 : i32, i32
  }
  func.func @transform_2(%arg0: i32) -> (i32, i32) {
    %c0_i32 = arith.constant 0 : i32
    %c0_i32_0 = arith.constant 0 : i32
    %c0_i32_1 = arith.constant 0 : i32
    return %c0_i32, %c0_i32_0 : i32, i32
  }
  func.func @transform_3(%arg0: i32) -> (i32, i32) {
    %c0_i32 = arith.constant 0 : i32
    %c0_i32_0 = arith.constant 0 : i32
    %c0_i32_1 = arith.constant 0 : i32
    return %c0_i32, %c0_i32_0 : i32, i32
  }
  func.func @transform_4(%arg0: i32) -> (i32, i32) {
    %c0_i32 = arith.constant 0 : i32
    %c0_i32_0 = arith.constant 0 : i32
    %c0_i32_1 = arith.constant 0 : i32
    return %c0_i32, %c0_i32_0 : i32, i32
  }
}

</mosaic_0001>

<bundles_post_ra>
// kernel: gcn_layer.1
= control target key start
LH: loop header
LB: loop body
LE: loop exit
PB: predicated region body
PF: predicated region fallthrough
CT: control target
= control target key end

     0   :  { %s732_s2 = inlined_call_operand.vmem [shape: bf16[128,128], index: 2, kind: input, shape index: {}]   ;;  %s733_s1 = inlined_call_operand.vmem [shape: bf16[128,128], index: 1, kind: input, shape index: {}]   ;;  %s734_s0 = inlined_call_operand.vmem [shape: bf16[128,128], index: 0, kind: input, shape index: {}]   ;;  %s735_s3 = inlined_call_operand.vmem [shape: f32[1,128], index: 3, kind: input, shape index: {}]   ;;  %s736_s4 = inlined_call_operand.vmem [shape: f32[128,128], index: 4, kind: output, shape index: {}]  }
   0x1   :  { %v560_v0 = vld [vmem:[%s732_s2 + $0x38] sm:$0xff]   ;;  %v561_v1 = vld [vmem:[%s732_s2 + $0x30] sm:$0xff]   ;;  %v562_v2 = vld [vmem:[%s732_s2 + $0x28] sm:$0xff]  }
   0x2   :  { %496 = vmatprep.subr.bf16.mxu0 %v560_v0  ;;  %v563_v3 = vld [vmem:[%s732_s2 + $0x20] sm:$0xff]   ;;  %v564_v5 = vld [vmem:[%s732_s2 + $0x18] sm:$0xff]   ;;  %v565_v6 = vld [vmem:[%s732_s2 + $0x10] sm:$0xff]  }
   0x3   :  { %497 = vmatpush3.bf16.msra.mxu0 %v560_v0  ;;  %v568_v4 = vld [vmem:[%s733_s1] sm:$0xff]   ;;  %v566_v7 = vld [vmem:[%s732_s2 + $0x8] sm:$0xff]   ;;  %v570_v10 = vld [vmem:[%s733_s1 + $0x10] sm:$0xff]  }
   0x4   :  { %498 = vmatprep.subr.bf16.mxu0 %v561_v1  ;;  %512 = vmatprep.mubr.bf16.mxu0 %v568_v4  ;;  %v567_v8 = vld [vmem:[%s732_s2] sm:$0xff]   ;;  %v569_v9 = vld [vmem:[%s733_s1 + $0x8] sm:$0xff]   ;;  %v571_v11 = vld [vmem:[%s733_s1 + $0x18] sm:$0xff]  }
   0x5   :  { %v572_v12 = vld [vmem:[%s733_s1 + $0x20] sm:$0xff]   ;;  %v573_v13 = vld [vmem:[%s733_s1 + $0x28] sm:$0xff]   ;;  %v574_v14 = vld [vmem:[%s733_s1 + $0x30] sm:$0xff]  }
   0x6   :  { %v575_v15 = vld [vmem:[%s733_s1 + $0x38] sm:$0xff]   ;;  %v576_v16 = vld [vmem:[%s734_s0] sm:$0xff]   ;;  %v577_v41 = vld [vmem:[%s734_s0 + $0x8] sm:$0xff]  }
   0x7   :  { %499 = vmatpush3.bf16.msra.mxu0 %v561_v1  ;;  %544 = vmatprep.mubr.bf16.mxu1 %v576_v16  ;;  %v578_v42 = vld [vmem:[%s734_s0 + $0x10] sm:$0xff]   ;;  %v579_v43 = vld [vmem:[%s734_s0 + $0x18] sm:$0xff]   ;;  %v580_v44 = vld [vmem:[%s734_s0 + $0x20] sm:$0xff]  }
   0x8   :  { %500 = vmatprep.subr.bf16.mxu0 %v562_v2  ;;  %v581_v45 = vld [vmem:[%s734_s0 + $0x28] sm:$0xff]   ;;  %v582_v46 = vld [vmem:[%s734_s0 + $0x30] sm:$0xff]   ;;  %v583_v47 = vld [vmem:[%s734_s0 + $0x38] sm:$0xff]  }
   0x9   :  { %v455_v48 = vld [vmem:[%s735_s3] ss:$0 sm:$0xff] }
   0xb   :  { %501 = vmatpush3.bf16.msra.mxu0 %v562_v2 }
   0xc   :  { %502 = vmatprep.subr.bf16.mxu0 %v563_v3 }
   0xf   :  { %503 = vmatpush3.bf16.msra.mxu0 %v563_v3 }
  0x10   :  { %504 = vmatprep.subr.bf16.mxu0 %v564_v5 }
  0x13   :  { %505 = vmatpush3.bf16.msra.mxu0 %v564_v5 }
  0x14   :  { %506 = vmatprep.subr.bf16.mxu0 %v565_v6 }
  0x17   :  { %507 = vmatpush3.bf16.msra.mxu0 %v565_v6 }
  0x18   :  { %508 = vmatprep.subr.bf16.mxu0 %v566_v7 }
  0x1b   :  { %509 = vmatpush3.bf16.msra.mxu0 %v566_v7 }
  0x1c   :  { %510 = vmatprep.subr.bf16.mxu0 %v567_v8 }
  0x1f   :  { %511 = vmatpush3.bf16.msra.mxu0 %v567_v8 }
  0x22   :  { %513 = vmatmul.mubr.bf16.vlgmr.msra.gmra.mxu0 %v569_v9 }
  0x23   :  { %516 = vmatprep.mubr.bf16.mxu0 %v570_v10 }
  0x2a   :  { %517 = vmatmul.mubr.bf16.gmra.mxu0 %v571_v11 }
  0x2b   :  { %520 = vmatprep.mubr.bf16.mxu0 %v572_v12 }
  0x32   :  { %521 = vmatmul.mubr.bf16.gmra.mxu0 %v573_v13 }
  0x33   :  { %524 = vmatprep.mubr.bf16.mxu0 %v574_v14 }
  0x3a   :  { %525 = vmatmul.mubr.bf16.gmra.mxu0 %v575_v15 }
  0xe2   :  { %v514_v17 = vpop.f32.mrf.mxu0 }
  0xe4   :  { %v180_v18 = vpop.f32.mrf.mxu0 }
  0xe6   :  { %v515_v19 = vpop.f32.mrf.mxu0 }
  0xe7   :  { %v260_v39 = vpack.c.bf16 %v515_v19, %v514_v17 }
  0xe8   :  { %v183_v20 = vpop.f32.mrf.mxu0 }
  0xe9   :  { %v259_v40 = vpack.c.bf16 %v183_v20, %v180_v18 }
  0xea   :  { %v518_v21 = vpop.f32.mrf.mxu0 }
  0xec   :  { %v196_v22 = vpop.f32.mrf.mxu0 }
  0xee   :  { %v519_v23 = vpop.f32.mrf.mxu0 }
  0xef   :  { %v262_v37 = vpack.c.bf16 %v519_v23, %v518_v21 }
  0xf0   :  { %v199_v24 = vpop.f32.mrf.mxu0 }
  0xf1   :  { %v261_v38 = vpack.c.bf16 %v199_v24, %v196_v22 }
  0xf2   :  { %v522_v25 = vpop.f32.mrf.mxu0 }
  0xf4   :  { %v212_v26 = vpop.f32.mrf.mxu0 }
  0xf6   :  { %v523_v27 = vpop.f32.mrf.mxu0 }
  0xf7   :  { %v264_v35 = vpack.c.bf16 %v523_v27, %v522_v25 }
  0xf8   :  { %v215_v28 = vpop.f32.mrf.mxu0 }
  0xf9   :  { %v263_v36 = vpack.c.bf16 %v215_v28, %v212_v26 }
  0xfa   :  { %v526_v29 = vpop.f32.mrf.mxu0 }
  0xfc   :  { %v228_v30 = vpop.f32.mrf.mxu0 }
  0xfe   :  { %v527_v31 = vpop.f32.mrf.mxu0 }
  0xff   :  { %v266_v32 = vpack.c.bf16 %v527_v31, %v526_v29 }
 0x100   :  { %v231_v33 = vpop.f32.mrf.mxu0 }
 0x101   :  { %v265_v34 = vpack.c.bf16 %v231_v33, %v228_v30  ;;  %528 = vmatprep.subr.bf16.mxu1 %v266_v32 }
 0x102   :  { %529 = vmatpush3.bf16.msra.mxu1 %v266_v32 }
 0x103   :  { %530 = vmatprep.subr.bf16.mxu1 %v265_v34 }
 0x106   :  { %531 = vmatpush3.bf16.msra.mxu1 %v265_v34 }
 0x107   :  { %532 = vmatprep.subr.bf16.mxu1 %v264_v35 }
 0x10a   :  { %533 = vmatpush3.bf16.msra.mxu1 %v264_v35 }
 0x10b   :  { %534 = vmatprep.subr.bf16.mxu1 %v263_v36 }
 0x10e   :  { %535 = vmatpush3.bf16.msra.mxu1 %v263_v36 }
 0x10f   :  { %536 = vmatprep.subr.bf16.mxu1 %v262_v37 }
 0x112   :  { %537 = vmatpush3.bf16.msra.mxu1 %v262_v37 }
 0x113   :  { %538 = vmatprep.subr.bf16.mxu1 %v261_v38 }
 0x116   :  { %539 = vmatpush3.bf16.msra.mxu1 %v261_v38 }
 0x117   :  { %540 = vmatprep.subr.bf16.mxu1 %v260_v39 }
 0x11a   :  { %541 = vmatpush3.bf16.msra.mxu1 %v260_v39 }
 0x11b   :  { %542 = vmatprep.subr.bf16.mxu1 %v259_v40 }
 0x11e   :  { %543 = vmatpush3.bf16.msra.mxu1 %v259_v40 }
 0x121   :  { %545 = vmatmul.mubr.bf16.vlgmr.msra.gmra.mxu1 %v577_v41 }
 0x122   :  { %548 = vmatprep.mubr.bf16.mxu1 %v578_v42 }
 0x129   :  { %549 = vmatmul.mubr.bf16.gmra.mxu1 %v579_v43 }
 0x12a   :  { %552 = vmatprep.mubr.bf16.mxu1 %v580_v44 }
 0x131   :  { %553 = vmatmul.mubr.bf16.gmra.mxu1 %v581_v45 }
 0x132   :  { %556 = vmatprep.mubr.bf16.mxu1 %v582_v46 }
 0x139   :  { %557 = vmatmul.mubr.bf16.gmra.mxu1 %v583_v47 }
 0x1e1   :  { %v546_v49 = vpop.f32.mrf.mxu1 }
 0x1e2   :  { %v365_v50 = vadd.f32 %v546_v49, %v455_v48 }
 0x1e3   :  { %v356_v51 = vpop.f32.mrf.mxu1 }
 0x1e4   :  { %421 = vst [vmem:[%s736_s4 + $0x10] sm:$0xff] %v365_v50  ;;  %v357_v52 = vadd.f32 %v455_v48, %v356_v51 }
 0x1e5   :  { %v547_v53 = vpop.f32.mrf.mxu1 }
 0x1e6   :  { %419 = vst [vmem:[%s736_s4] sm:$0xff] %v357_v52  ;;  %v368_v54 = vadd.f32 %v547_v53, %v455_v48 }
 0x1e7   :  { %v359_v55 = vpop.f32.mrf.mxu1 }
 0x1e8   :  { %422 = vst [vmem:[%s736_s4 + $0x18] sm:$0xff] %v368_v54  ;;  %v360_v56 = vadd.f32 %v455_v48, %v359_v55 }
 0x1e9   :  { %v550_v57 = vpop.f32.mrf.mxu1 }
 0x1ea   :  { %420 = vst [vmem:[%s736_s4 + $0x8] sm:$0xff] %v360_v56  ;;  %v381_v58 = vadd.f32 %v550_v57, %v455_v48 }
 0x1eb   :  { %v372_v59 = vpop.f32.mrf.mxu1 }
 0x1ec   :  { %425 = vst [vmem:[%s736_s4 + $0x30] sm:$0xff] %v381_v58  ;;  %v373_v60 = vadd.f32 %v455_v48, %v372_v59 }
 0x1ed   :  { %v551_v61 = vpop.f32.mrf.mxu1 }
 0x1ee   :  { %423 = vst [vmem:[%s736_s4 + $0x20] sm:$0xff] %v373_v60  ;;  %v384_v62 = vadd.f32 %v551_v61, %v455_v48 }
 0x1ef   :  { %v375_v63 = vpop.f32.mrf.mxu1 }
 0x1f0   :  { %426 = vst [vmem:[%s736_s4 + $0x38] sm:$0xff] %v384_v62  ;;  %v376_v0 = vadd.f32 %v455_v48, %v375_v63 }
 0x1f1   :  { %v554_v1 = vpop.f32.mrf.mxu1 }
 0x1f2   :  { %424 = vst [vmem:[%s736_s4 + $0x28] sm:$0xff] %v376_v0  ;;  %v397_v2 = vadd.f32 %v554_v1, %v455_v48 }
 0x1f3   :  { %v388_v3 = vpop.f32.mrf.mxu1 }
 0x1f4   :  { %429 = vst [vmem:[%s736_s4 + $0x50] sm:$0xff] %v397_v2  ;;  %v389_v4 = vadd.f32 %v455_v48, %v388_v3 }
 0x1f5   :  { %v555_v5 = vpop.f32.mrf.mxu1 }
 0x1f6   :  { %427 = vst [vmem:[%s736_s4 + $0x40] sm:$0xff] %v389_v4  ;;  %v400_v6 = vadd.f32 %v555_v5, %v455_v48 }
 0x1f7   :  { %v391_v7 = vpop.f32.mrf.mxu1 }
 0x1f8   :  { %430 = vst [vmem:[%s736_s4 + $0x58] sm:$0xff] %v400_v6  ;;  %v392_v8 = vadd.f32 %v455_v48, %v391_v7 }
 0x1f9   :  { %v558_v9 = vpop.f32.mrf.mxu1 }
 0x1fa   :  { %428 = vst [vmem:[%s736_s4 + $0x48] sm:$0xff] %v392_v8  ;;  %v413_v10 = vadd.f32 %v558_v9, %v455_v48 }
 0x1fb   :  { %v404_v11 = vpop.f32.mrf.mxu1 }
 0x1fc   :  { %433 = vst [vmem:[%s736_s4 + $0x70] sm:$0xff] %v413_v10  ;;  %v405_v12 = vadd.f32 %v455_v48, %v404_v11 }
 0x1fd   :  { %v559_v13 = vpop.f32.mrf.mxu1 }
 0x1fe   :  { %431 = vst [vmem:[%s736_s4 + $0x60] sm:$0xff] %v405_v12  ;;  %v416_v14 = vadd.f32 %v559_v13, %v455_v48 }
 0x1ff   :  { %v407_v15 = vpop.f32.mrf.mxu1 }
 0x200   :  { %434 = vst [vmem:[%s736_s4 + $0x78] sm:$0xff] %v416_v14  ;;  %v408_v16 = vadd.f32 %v455_v48, %v407_v15 }
 0x202   :  { %432 = vst [vmem:[%s736_s4 + $0x68] sm:$0xff] %v408_v16 }

</bundles_post_ra>
